<compile_context>
chip_gen: v5e
topology: v5e:2x2
jax: 0.10.0
libtpu: 0.0.40
codegen_flags: <defaults>
</compile_context>

<pallas_src>
import functools

import jax
import jax.numpy as jnp
from jax import lax
from jax.experimental import pallas as pl
from jax.experimental.pallas import tpu as pltpu

_LANE = 128            # lane width; also the fixed halo-block width


def _round_up(a, b):
    return (a + b - 1) // b * b


def _cdiv(a, b):
    return (a + b - 1) // b


# ----------------------------- Pallas kernel --------------------------------
def _conv_bias_relu_kernel(w_ref, b_ref, xm_ref, xh_ref, o_ref, xwin_ref):
    """One lane-dense (Cout, tj) output tile of the flattened, kH-folded conv.

    w_ref   : (kW, Cout, CK) bf16   per-column-tap folded weights, CK = kH*Cin
    b_ref   : (Cout, 1)      f32    bias
    xm_ref  : (CK, tj)       bf16   main slab of the kH-folded flattened input
    xh_ref  : (CK, 128)      bf16   lane-aligned halo right after the slab
    o_ref   : (Cout, tj)     bf16   output tile (flattened-NCHW order)
    xwin_ref: (CK, tj+128)   bf16   scratch: contiguous slab+halo window
    """
    kW = w_ref.shape[0]
    CK, tj = xm_ref.shape

    slab = xm_ref[...]
    # Contiguous window for the shifted column taps (both stores lane-aligned).
    xwin_ref[:, :tj] = slab
    xwin_ref[:, tj:] = xh_ref[...]

    # Column tap dw=0 reads the pipelined input directly (no extra copy); the
    # dw>=1 taps are lane-shifted views of the window.  f32 MXU accumulation.
    acc = jnp.dot(w_ref[0], slab, preferred_element_type=jnp.float32)
    for dw in range(1, kW):                       # static python loop (kW-1 taps)
        acc = acc + jnp.dot(w_ref[dw], xwin_ref[:, dw:dw + tj],
                            preferred_element_type=jnp.float32)

    acc = acc + b_ref[...]                        # (Cout, 1) broadcasts over lanes
    o_ref[...] = jnp.maximum(acc, 0.0).astype(o_ref.dtype)      # ReLU, bf16 out


# ------------------------------ Conv2dBlock ----------------------------------
def conv2d_block_forward(x, weight, bias, *, stride, padding,
                         tj_target=4096, out_dtype=jnp.bfloat16):
    """ReLU(Conv2d(ZeroPad2d(padding)(x)))  -- Conv2dBlock with norm='none'.

    x: [N, Cin, H, W] f32; weight: [Cout, Cin, kH, kW]; bias: [Cout].
    Returns [N, Cout, OH, OW] in `out_dtype` (bf16 by default; bf16 MXU feed,
    f32 accumulation)."""
    N, Cin, H, W = x.shape
    Cout, _, kH, kW = weight.shape
    assert kW - 1 <= _LANE, "kernel width halo exceeds one 128-lane block"

    Hp, Wp = H + 2 * padding, W + 2 * padding
    OH = (Hp - kH) // stride + 1
    OW = (Wp - kW) // stride + 1
    CK = kH * Cin                                  # folded channel dim

    # Flattened-output formulation: position j = oh*Wp + c (only c = ow*stride,
    # ow < OW is kept) with
    #   out[n,co,j] = sum_{dw,dh,ci} W[co,ci,dh,dw] * xk[n, dh*Cin+ci, j+dw]
    # where xk already has the (oh*stride + dh) row offset folded in.
    j_rows = OH * Wp

    # Tile size: big (amortizes ~0.35us/step + DMA efficiency), 128-lane multiples
    # only; the halo is a fixed 128-wide block so tj is decoupled from it.
    tj_cap = _round_up(j_rows, _LANE)
    tj = min(_round_up(max(int(tj_target), _LANE), _LANE), tj_cap)
    if N * _cdiv(j_rows, tj) < 2:                  # v7x: keep both TensorCores busy
        tj = max(_LANE, _round_up(_cdiv(j_rows, 2), _LANE))
    num_jb = _cdiv(j_rows, tj)
    j_total = num_jb * tj
    l_pad = j_total + _LANE                        # + halo block after last tile

    # Zero padding (nn.ZeroPad2d) + kH/row-stride folding: for each dh take the
    # strided rows (oh*stride + dh), flatten, zero-pad the tail.  ~kH x input HBM
    # traffic, but removes kH lane-shift passes per tile and triples MXU K.
    xp = jnp.pad(x, ((0, 0), (0, 0), (padding, padding), (padding, padding)))
    planes = []
    for dh in range(kH):
        plane = xp[:, :, dh:dh + (OH - 1) * stride + 1:stride, :]   # (N,Cin,OH,Wp)
        planes.append(plane.reshape(N, Cin, OH * Wp))
    xk = jnp.concatenate(planes, axis=1)                            # (N, CK, OH*Wp)
    xk = jnp.pad(xk, ((0, 0), (0, 0), (0, l_pad - OH * Wp))).astype(jnp.bfloat16)

    # Folded weights: wf[dw, co, dh*Cin+ci] = weight[co, ci, dh, dw].
    wf = jnp.transpose(weight, (3, 0, 2, 1)).reshape(kW, Cout, CK)
    wf = wf.astype(jnp.bfloat16)
    b2 = bias.reshape(Cout, 1).astype(jnp.float32)

    halo_blocks_per_tile = tj // _LANE

    out_t = pl.pallas_call(
        _conv_bias_relu_kernel,
        out_shape=jax.ShapeDtypeStruct((N, Cout, j_total), out_dtype),
        grid_spec=pltpu.PrefetchScalarGridSpec(
            num_scalar_prefetch=0,
            grid=(N, num_jb),
            in_specs=[
                # Grid-invariant weight / bias (tiny: re-DMA per step is noise at
                # this size; pl.Buffered(1) would remove it for large Cout*K).
                pl.BlockSpec((kW, Cout, CK), lambda n, jb: (0, 0, 0)),
                pl.BlockSpec((Cout, 1), lambda n, jb: (0, 0)),
                # Main tj-wide slab (auto-pipelined, lane-aligned).
                pl.BlockSpec((None, CK, tj), lambda n, jb: (n, 0, jb)),
                # Fixed 128-wide halo starting right after the slab.
                pl.BlockSpec((None, CK, _LANE),
                             lambda n, jb: (n, 0, (jb + 1) * halo_blocks_per_tile)),
            ],
            out_specs=pl.BlockSpec((None, Cout, tj), lambda n, jb: (n, 0, jb)),
            scratch_shapes=[pltpu.VMEM((CK, tj + _LANE), jnp.bfloat16)],
        ),
        compiler_params=pltpu.CompilerParams(
            dimension_semantics=("parallel", "parallel"),
            vmem_limit_bytes=32 * 1024 * 1024),
    )(wf, b2, xk, xk)

    # Output is already in flattened NCHW order: slice valid rows / columns.
    full = out_t[:, :, :j_rows].reshape(N, Cout, OH, Wp)
    out = full[:, :, :, ::stride][:, :, :, :OW]
    return out


# --------------------------------- main --------------------------------------
if __name__ == "__main__":
    # Module config: Conv2dBlock(input_dim=4, output_dim=8, kernel_size=3,
    #                            stride=1, padding=1, norm='none',
    #                            activation='relu', pad_type='zero')
    N, Cin, H, W = 2, 4, 16, 16
    Cout, k, stride, padding = 8, 3, 1, 1

    key = jax.random.PRNGKey(0)
    kx, kw, kb = jax.random.split(key, 3)
    x = jax.random.normal(kx, (N, Cin, H, W), dtype=jnp.float32)
    fan_in = Cin * k * k
    weight = jax.random.normal(kw, (Cout, Cin, k, k), dtype=jnp.float32) / jnp.sqrt(fan_in)
    bias = jax.random.normal(kb, (Cout,), dtype=jnp.float32) * 0.1

    fwd = jax.jit(functools.partial(conv2d_block_forward,
                                    stride=stride, padding=padding))
    out = fwd(x, weight, bias)
    jax.block_until_ready(out)
    assert out.shape == (N, Cout, H, W)
    assert out.dtype == jnp.bfloat16

    # Reference on the same precision contract: bf16-rounded operands, f32
    # conv accumulate (the kernel's only extra error is the bf16 output cast).
    xb = x.astype(jnp.bfloat16).astype(jnp.float32)
    wb = weight.astype(jnp.bfloat16).astype(jnp.float32)
    ref = lax.conv_general_dilated(
        xb, wb, window_strides=(stride, stride),
        padding=[(padding, padding), (padding, padding)],
        dimension_numbers=("NCHW", "OIHW", "NCHW"))
    ref = jnp.maximum(ref + bias[None, :, None, None], 0.0)
    assert jnp.allclose(out.astype(jnp.float32), ref, atol=3e-2, rtol=3e-2), \
        "mismatch vs reference"

    print("KERNEL_OK")
</pallas_src>

<mosaic_0001>
module attributes {stable_mosaic.version = 11 : i64} {
  func.func @_conv_bias_relu_kernel(%arg0: i32, %arg1: i32, %arg2: memref<3x8x12xbf16, #tpu.memory_space<vmem>>, %arg3: memref<8x1xf32, #tpu.memory_space<vmem>>, %arg4: memref<1x12x384xbf16, #tpu.memory_space<vmem>>, %arg5: memref<1x12x128xbf16, #tpu.memory_space<vmem>>, %arg6: memref<1x8x384xbf16, #tpu.memory_space<vmem>>, %arg7: memref<12x512xbf16, #tpu.memory_space<vmem>>) attributes {dimension_semantics = [#tpu.dimension_semantics<parallel>, #tpu.dimension_semantics<parallel>], iteration_bounds = array<i64: 2, 1>, scalar_prefetch = 0 : i64, scratch_operands = 1 : i64, tpu.core_type = #tpu.core_type<tc>, window_params = [{pipeline_mode = #tpu.pipeline_mode<synchronous>, transform_indices = @transform_0, window_bounds = array<i64: 3, 8, 12>}, {pipeline_mode = #tpu.pipeline_mode<synchronous>, transform_indices = @transform_1, window_bounds = array<i64: 8, 1>}, {transform_indices = @transform_2, window_bounds = array<i64: 1, 12, 384>}, {transform_indices = @transform_3, window_bounds = array<i64: 1, 12, 128>}, {transform_indices = @transform_4, window_bounds = array<i64: 1, 8, 384>}]} {
    %c0 = arith.constant 0 : index
    %c0_0 = arith.constant 0 : index
    %c0_1 = arith.constant 0 : index
    %0 = vector.load %arg4[%c0, %c0_0, %c0_1] : memref<1x12x384xbf16, #tpu.memory_space<vmem>>, vector<1x12x384xbf16>
    %1 = vector.shape_cast %0 : vector<1x12x384xbf16> to vector<12x384xbf16>
    %c0_2 = arith.constant 0 : index
    %c0_3 = arith.constant 0 : index
    %2 = vector.load %arg7[%c0_2, %c0_3] : memref<12x512xbf16, #tpu.memory_space<vmem>>, vector<12x384xbf16>
    tpu.vector_store %arg7[%c0_2, %c0_3], %1 {strides = array<i32>} : memref<12x512xbf16, #tpu.memory_space<vmem>>, vector<12x384xbf16>,
    %c0_4 = arith.constant 0 : index
    %c0_5 = arith.constant 0 : index
    %c0_6 = arith.constant 0 : index
    %3 = vector.load %arg5[%c0_4, %c0_5, %c0_6] : memref<1x12x128xbf16, #tpu.memory_space<vmem>>, vector<1x12x128xbf16>
    %4 = vector.shape_cast %3 : vector<1x12x128xbf16> to vector<12x128xbf16>
    %c0_7 = arith.constant 0 : index
    %c384 = arith.constant 384 : index
    %5 = vector.load %arg7[%c0_7, %c384] : memref<12x512xbf16, #tpu.memory_space<vmem>>, vector<12x128xbf16>
    tpu.vector_store %arg7[%c0_7, %c384], %4 {strides = array<i32>} : memref<12x512xbf16, #tpu.memory_space<vmem>>, vector<12x128xbf16>,
    %c0_8 = arith.constant 0 : index
    %c0_9 = arith.constant 0 : index
    %c0_10 = arith.constant 0 : index
    %6 = vector.load %arg2[%c0_8, %c0_9, %c0_10] : memref<3x8x12xbf16, #tpu.memory_space<vmem>>, vector<1x8x12xbf16>
    %7 = vector.shape_cast %6 : vector<1x8x12xbf16> to vector<8x12xbf16>
    %cst = arith.constant dense<0.000000e+00> : vector<8x384xf32>
    %8 = tpu.matmul %7, %1, %cst {dimension_numbers = #tpu.dot_dimension_numbers<[1], [0], [0], [1], [0, 0, 1, 1], [], []>} : vector<8x12xbf16>, vector<12x384xbf16>, vector<8x384xf32> -> vector<8x384xf32>
    %c1 = arith.constant 1 : index
    %c0_11 = arith.constant 0 : index
    %c0_12 = arith.constant 0 : index
    %9 = vector.load %arg2[%c1, %c0_11, %c0_12] : memref<3x8x12xbf16, #tpu.memory_space<vmem>>, vector<1x8x12xbf16>
    %10 = vector.shape_cast %9 : vector<1x8x12xbf16> to vector<8x12xbf16>
    %c0_13 = arith.constant 0 : index
    %c1_14 = arith.constant 1 : index
    %11 = vector.load %arg7[%c0_13, %c1_14] : memref<12x512xbf16, #tpu.memory_space<vmem>>, vector<12x384xbf16>
    %cst_15 = arith.constant dense<0.000000e+00> : vector<8x384xf32>
    %12 = tpu.matmul %10, %11, %cst_15 {dimension_numbers = #tpu.dot_dimension_numbers<[1], [0], [0], [1], [0, 0, 1, 1], [], []>} : vector<8x12xbf16>, vector<12x384xbf16>, vector<8x384xf32> -> vector<8x384xf32>
    %13 = arith.addf %8, %12 : vector<8x384xf32>
    %c2 = arith.constant 2 : index
    %c0_16 = arith.constant 0 : index
    %c0_17 = arith.constant 0 : index
    %14 = vector.load %arg2[%c2, %c0_16, %c0_17] : memref<3x8x12xbf16, #tpu.memory_space<vmem>>, vector<1x8x12xbf16>
    %15 = vector.shape_cast %14 : vector<1x8x12xbf16> to vector<8x12xbf16>
    %c0_18 = arith.constant 0 : index
    %c2_19 = arith.constant 2 : index
    %16 = vector.load %arg7[%c0_18, %c2_19] : memref<12x512xbf16, #tpu.memory_space<vmem>>, vector<12x384xbf16>
    %cst_20 = arith.constant dense<0.000000e+00> : vector<8x384xf32>
    %17 = tpu.matmul %15, %16, %cst_20 {dimension_numbers = #tpu.dot_dimension_numbers<[1], [0], [0], [1], [0, 0, 1, 1], [], []>} : vector<8x12xbf16>, vector<12x384xbf16>, vector<8x384xf32> -> vector<8x384xf32>
    %18 = arith.addf %13, %17 : vector<8x384xf32>
    %c0_21 = arith.constant 0 : index
    %c0_22 = arith.constant 0 : index
    %19 = vector.load %arg3[%c0_21, %c0_22] : memref<8x1xf32, #tpu.memory_space<vmem>>, vector<8x1xf32>
    %20 = vector.broadcast %19 : vector<8x1xf32> to vector<8x384xf32>
    %21 = arith.addf %18, %20 : vector<8x384xf32>
    %cst_23 = arith.constant 0.000000e+00 : f32
    %22 = vector.broadcast %cst_23 : f32 to vector<8x384xf32>
    %23 = arith.maximumf %21, %22 : vector<8x384xf32>
    %24 = arith.truncf %23 : vector<8x384xf32> to vector<8x384xbf16>
    %c0_24 = arith.constant 0 : index
    %c0_25 = arith.constant 0 : index
    %c0_26 = arith.constant 0 : index
    %25 = vector.load %arg6[%c0_24, %c0_25, %c0_26] : memref<1x8x384xbf16, #tpu.memory_space<vmem>>, vector<1x8x384xbf16>
    %26 = vector.shape_cast %25 : vector<1x8x384xbf16> to vector<8x384xbf16>
    %27 = vector.shape_cast %24 : vector<8x384xbf16> to vector<1x8x384xbf16>
    tpu.vector_store %arg6[%c0_24, %c0_25, %c0_26], %27 {strides = array<i32>} : memref<1x8x384xbf16, #tpu.memory_space<vmem>>, vector<1x8x384xbf16>,
    return
  }
  func.func @transform_0(%arg0: i32, %arg1: i32) -> (i32, i32, i32) {
    %c0_i32 = arith.constant 0 : i32
    %c0_i32_0 = arith.constant 0 : i32
    %c0_i32_1 = arith.constant 0 : i32
    %c0_i32_2 = arith.constant 0 : i32
    return %c0_i32, %c0_i32_0, %c0_i32_1 : i32, i32, i32
  }
  func.func @transform_1(%arg0: i32, %arg1: i32) -> (i32, i32) {
    %c0_i32 = arith.constant 0 : i32
    %c0_i32_0 = arith.constant 0 : i32
    %c0_i32_1 = arith.constant 0 : i32
    return %c0_i32, %c0_i32_0 : i32, i32
  }
  func.func @transform_2(%arg0: i32, %arg1: i32) -> (i32, i32, i32) {
    %c0_i32 = arith.constant 0 : i32
    %c0_i32_0 = arith.constant 0 : i32
    return %arg0, %c0_i32, %arg1 : i32, i32, i32
  }
  func.func @transform_3(%arg0: i32, %arg1: i32) -> (i32, i32, i32) {
    %c1_i32 = arith.constant 1 : i32
    %0 = arith.addi %arg1, %c1_i32 : i32
    %c3_i32 = arith.constant 3 : i32
    %1 = arith.muli %0, %c3_i32 : i32
    %c0_i32 = arith.constant 0 : i32
    %c0_i32_0 = arith.constant 0 : i32
    return %arg0, %c0_i32, %1 : i32, i32, i32
  }
  func.func @transform_4(%arg0: i32, %arg1: i32) -> (i32, i32, i32) {
    %c0_i32 = arith.constant 0 : i32
    %c0_i32_0 = arith.constant 0 : i32
    return %arg0, %c0_i32, %arg1 : i32, i32, i32
  }
}

</mosaic_0001>

<bundles_post_ra>
// kernel: conv2d_block_forward.1
= control target key start
LH: loop header
LB: loop body
LE: loop exit
PB: predicated region body
PF: predicated region fallthrough
CT: control target
= control target key end

     0   :  { %s1279_s15 = smov 0   ;;  %s1281_s16 = smov 0   ;;  %s1403_s0 = inlined_call_operand.vmem [shape: bf16[3,8,12], index: 0, kind: input, shape index: {}]   ;;  %s1404_s1 = inlined_call_operand.vmem [shape: f32[8,1], index: 1, kind: input, shape index: {}]   ;;  %s1405_s2 = inlined_call_operand.vmem [shape: bf16[2,12,512], index: 2, kind: input, shape index: {}, may-alias: {2,3}]   ;;  %s1406_s3 = inlined_call_operand.vmem [shape: bf16[2,12,512], index: 3, kind: input, shape index: {}, may-alias: {2,3}]   ;;  %s1407_s4 = inlined_call_operand.vmem [shape: bf16[2,8,384], index: 4, kind: output, shape index: {}]  }
   0x1   :  { %s1283_s17 = smov 0   ;;  %s1285_s18 = smov 0  }
   0x2   :  { %s1287_s19 = smov 0  }
   0x3 LB: > { %s26_s20 = sadd.s32 1, %s1241_s18  ;;  %p84_p1 = scmp.ne.s32.totalorder %s1233_s16, %s1229_s15  ;;  %s1245_s19 = sphi %s1287_s19, %s14_s19   ;;  %s1241_s18 = sphi %s1285_s18, %s1412_s18   ;;  %s1237_s17 = sphi %s1283_s17, %s1411_s17   ;;  %s1233_s16 = sphi %s1281_s16, %s1410_s16   ;;  %s1229_s15 = sphi %s1279_s15, %s1409_s15  }
   0x4   : > { %p28_p0 = scmp.ge.s32.totalorder %s26_s20, 2  ;;  %p85_p2 = scmp.eq.s32.totalorder %s1245_s19, 0 }
   0x5   : > { %s77_s23 = sadd.s32 1, %s1233_s16  ;;  %p1038_p5 = scmp.ge.s32.totalorder %s1245_s19, 2 }
   0x6   : > { %s1414_s20 = smov (%p28_p0, %s26_s20), 0  ;;  %p1310_p3 = por %p85_p2, %p84_p1 }
   0x7   : > { %s72_s22 = ssub.s32 %s1241_s18, %s1414_s20  ;;  %176 = sbr.rel (%p1038_p5) target bundleno = 31 (0x1f), region = 24 }
   0x8   : > { %p75_p4 = scmp.eq.s32.totalorder %s72_s22, 0 }
   0xa   : > { %s1318_s24 = scalar_select %p75_p4, %s1233_s16, %s77_s23  }
   0xc   : > { %179 = sbr.rel (!%p1310_p3) target bundleno = 25 (0x19), region = 28  ;;  %s181_s25 = sand.u32 (%p1310_p3), 1, %s1233_s16  }
   0xd   : > { %s1102_s26 = sshll.u32 (%p1310_p3), %s1241_s18, 5  ;;  %s1111_s27 = smul.u32 (%p1310_p3), 24, %s181_s25 }
   0xe   : > { %s193_s30 = scalar_lea.vmem (%p1310_p3), %s1405_s2, %s1102_s26   ;;  %s1247_s6 = smov (%p1310_p3), 0  }
   0xf   : > { %s183_s5 = scalar_lea.vmem (%p1310_p3), [#allocation3], %s1111_s27  }
  0x11 LB: >> { %v439_v0 = vld [vmem:[%s193_s30] sm:$0xff]  ;;  %v441_v1 = vld [vmem:[%s193_s30 + $0x10] sm:$0xff]  ;;  %s433_s6 = sadd.s32 1, %s1249_s6   ;;  %s1249_s6 = sphi %s1247_s6, %s433_s6  }
  0x12   : >> { %440 = vst [vmem:[%s183_s5] sm:$0xff] %v439_v0  ;;  %p432_p6 = scmp.ge.s32.totalorder %s433_s6, 1 }
  0x13   : >> { %442 = vst [vmem:[%s183_s5 + $0xc] sm:$0xff] %v441_v1  ;;  %v1049_v2 = vld [vmem:[%s193_s30 + $0x8] sm:$0xf] (%p432_p6)  ;;  %v1051_v3 = vld [vmem:[%s193_s30 + $0x18] sm:$0xf] (%p432_p6) }
  0x14   : > { %435 = sbr.rel (!%p432_p6) target bundleno = 17 (0x11), region = 239  ;;  %1050 = vst [vmem:[%s183_s5 + $0x8] sm:$0xf] (%p432_p6), %v1049_v2 }
  0x15   : > { %1052 = vst [vmem:[%s183_s5 + $0x14] sm:$0xf] (%p432_p6), %v1051_v3 }
  0x19 PF: > { %467 = sbr.rel (!%p1310_p3) target bundleno = 31 (0x1f), region = 94  ;;  %s469_s7 = sand.u32 (%p1310_p3), 1, %s1233_s16  }
  0x1a   : > { %s1103_s8 = sshll.u32 (%p1310_p3), %s1241_s18, 5  ;;  %s1053_s9 = sshll.u32 (%p1310_p3), %s469_s7, 3 }
  0x1b   : > { %s906_s12 = scalar_lea.vmem (%p1310_p3), %s1406_s3, %s1103_s8  ;;  %s471_s13 = scalar_lea.vmem (%p1310_p3), [#allocation4], %s1053_s9 }
  0x1c   : > { %v1056_v4 = vld [vmem:[%s906_s12 + $0xc] sm:$0xf] (%p1310_p3)  ;;  %v1057_v5 = vld [vmem:[%s906_s12 + $0x1c] sm:$0xf] (%p1310_p3) }
  0x1d   : > { %495 = vst [vmem:[%s471_s13] sm:$0xf] (%p1310_p3), %v1056_v4 }
  0x1e   : > { %497 = vst [vmem:[%s471_s13 + $0x4] sm:$0xf] %v1057_v5 }
  0x1f PF: > { %p1058_p7 = scmp.ge.s32.totalorder %s1245_s19, 1  ;;  %p524_p8 = scmp.lt.s32.totalorder %s1245_s19, 3 }
  0x21   : > { %p525_p9 = pnand %p1058_p7, %p524_p8 }
  0x22   : > { %s531_s14 = sand.u32 (!%p525_p9), 1, %s1229_s15   ;;  %s1251_s15 = smov (!%p525_p9), 127  }
  0x23   : > { %528 = sbr.rel (%p525_p9) target bundleno = 349 (0x15d), region = 135  ;;  %s1059_s22 = sshll.u32 (!%p525_p9), %s531_s14, 3 }
  0x24   : > { %s1112_s21 = smul.u32 (!%p525_p9), 24, %s531_s14  ;;  %s540_s25 = scalar_lea.vmem (!%p525_p9), [#allocation4], %s1059_s22 }
  0x25   : > { %s1252_s26 = smov (!%p525_p9), 126   ;;  %p579_p10 = scmp.lt.s32.totalorder (!%p525_p9), %s1237_s17, 1 }
  0x26   : > { %s1338_s23 = scalar_lea.vmem (!%p525_p9), [#allocation3], %s1112_s21 }
  0x28   : > { %v590_v6 = vld [vmem:[%s1338_s23 + $0x8] sm:$0xf]  ;;  %v592_v7 = vld [vmem:[%s1338_s23 + $0x14] sm:$0x3]  ;;  %v589_v8 = vld [vmem:[%s1338_s23] sm:$0xff]  ;;  %vm640_vm0 = vcmask 1045504  }
  0x29   : > { %594 = vst [vmem:[#allocation2 + $0x8] sm:$0xf] %v590_v6  ;;  %v591_v9 = vld [vmem:[%s1338_s23 + $0xc] sm:$0x33]  ;;  %v598_v11 = vld [vmem:[%s540_s25 + $0x4] sm:$0x3] }
  0x2a   : > { %596 = vst [vmem:[#allocation2 + $0x18] sm:$0x3] %v592_v7  ;;  %v597_v10 = vld [vmem:[%s540_s25] sm:$0xf]  ;;  %v1105_v25 = vld [vmem:[%s1338_s23 + $0x8] sm:$0x30] }
  0x2b   : > { %593 = vst [vmem:[#allocation2] sm:$0xff] %v589_v8  ;;  %v1083_v24 = vld [vmem:[%s1338_s23] sm:$0xf]  ;;  %vm636_vm1 = vcmask 97280   ;;  %v1104_v32 = vld [vmem:[%s1338_s23 + $0x4] sm:$0xf] }
  0x2c   : > { %595 = vst [vmem:[#allocation2 + $0x10] sm:$0x33] %v591_v9  ;;  %v1084_v26 = vor.u32 %v1105_v25, %v1083_v24  ;;  %v601_v28 = vld [vmem:[%s1403_s0] sm:$0xf]  ;;  %v1085_v33 = vld [vmem:[%s1338_s23 + $0xc] sm:$0x30] }
  0x2d   : > { %599 = vst [vmem:[#allocation2 + $0xc] sm:$0xf] %v597_v10  ;;  %vm763_vm2 = vcmask 1031168   ;;  %v1091_v35 = vld [vmem:[%s1338_s23 + $0x8] sm:$0xf]  ;;  %vm632_vm3 = vcmask 1039360   ;;  %v1088_v38 = vor.u32 %v1104_v32, %v1085_v33 }
  0x2e   : > { %600 = vst [vmem:[#allocation2 + $0x1c] sm:$0x3] %v598_v11  ;;  %v706_v27 = vsel %vm640_vm0, %v1084_v26, 0  ;;  %v1106_v36 = vld [vmem:[%s1338_s23 + $0x10] sm:$0x30]  ;;  %v821_v53 = vld [vmem:[%s1404_s1] sm:$0xff] }
  0x2f   : > { %721 = vmatpush.bf16.msra.mxu3 %v706_v27  ;;  %v1092_v40 = vor.u32 %v1106_v36, %v1091_v35  ;;  %v1061_v47 = vld [vmem:[%s1403_s0 + $0x4] sm:$0xf]  ;;  %v709_v48 = vsel %vm640_vm0, %v1088_v38, 0  ;;  %v1253_v54 = vmov 0   ;;  %v1096_v60 = vld [vmem:[%s1403_s0 + $0x8] sm:$0xf] }
  0x30   : > { %v1072_v12 = vld [vmem:[#allocation2 + $0x8] sm:$0xf]  ;;  %1189 = vset.pattern.permute.xlu2 %v1253_v54  ;;  %1190 = vset.pattern.permute.xlu0 %v1253_v54  ;;  %s1416_s17 = smov (!%p579_p10, %s1237_s17), 1 }
  0x31   : > { %v1110_v13 = vld [vmem:[#allocation2 + $0x14] sm:$0x30]  ;;  %v712_v51 = vsel %vm640_vm0, %v1092_v40, 0  ;;  %s1113_s9 = smul.u32 12, %s1416_s17 }
  0x32   : > { %v1073_v14 = vor.u32 %v1110_v13, %v1072_v12  ;;  %v1064_v15 = vld [vmem:[#allocation2] sm:$0xf]  ;;  %v1107_v20 = vld [vmem:[#allocation2 + $0x4] sm:$0xf]  ;;  %1093 = vmatmul.msk.bf16.vlgmr.msra.gmra.mxu3 %vm636_vm1, %v601_v28 }
  0x33   : > { %v1109_v16 = vld [vmem:[#allocation2 + $0xc] sm:$0x30]  ;;  %v1066_v21 = vld [vmem:[#allocation2 + $0x10] sm:$0x30]  ;;  %s586_s12 = scalar_lea.vmem %s1407_s4, %s1113_s9 }
  0x34   : > { %628 = vrot.lane.b32.xlu1 %v1073_v14, %s1251_s15  ;;  %v1065_v17 = vor.u32 %v1109_v16, %v1064_v15  ;;  %v1108_v18 = vld [vmem:[#allocation2 + $0xc] sm:$0xf]  ;;  %v1069_v23 = vor.u32 %v1107_v20, %v1066_v21 }
  0x35   : > { %v1074_v19 = vld [vmem:[#allocation2 + $0x18] sm:$0x30] }
  0x36   : > { %624 = vrot.lane.b32.xlu0 %v1065_v17, %s1251_s15  ;;  %755 = vrot.lane.b32.xlu2 %v1065_v17, %s1252_s26  ;;  %v1077_v22 = vor.u32 %v1108_v18, %v1074_v19 }
  0x3c   : > { %630 = vrot.lane.b32.xlu1 %v1077_v22, %s1251_s15 }
  0x3e   : > { %626 = vrot.lane.b32.xlu0 %v1069_v23, %s1251_s15  ;;  %757 = vrot.lane.b32.xlu2 %v1069_v23, %s1252_s26 }
  0x44   : > { %761 = vrot.lane.b32.xlu1 %v1077_v22, %s1252_s26 }
  0x46   : > { %759 = vrot.lane.b32.xlu0 %v1073_v14, %s1252_s26  ;;  %824 = vperm.xlu2 %1189, %v821_v53  }
  0x90   : > { %v756_v29 = vpop.permute.xlu2 %755 }
  0x98   : > { %v758_v34 = vpop.permute.xlu2 %757 }
  0x99   : > { %v764_v37 = vsel %vm763_vm2, %v756_v29, %v758_v34 }
  0x9a   : > { %v771_v42 = vsel %vm640_vm0, %v764_v37, 0 }
  0xa0   : > { %v825_v9 = vpop.permute.xlu2 %824 }
  0xa6   : > { %v629_v30 = vpop.permute.xlu1 %628 }
  0xa8   : > { %v625_v31 = vpop.permute.xlu0 %624 }
  0xae   : > { %v631_v39 = vpop.permute.xlu1 %630 }
  0xaf   : > { %v635_v41 = vsel %vm632_vm3, %v629_v30, %v631_v39 }
  0xb0   : > { %v627_v43 = vpop.permute.xlu0 %626  ;;  %v648_v44 = vsel %vm640_vm0, %v635_v41, 0 }
  0xb1   : > { %v633_v45 = vsel %vm632_vm3, %v625_v31, %v627_v43  ;;  %v634_v46 = vsel %vm632_vm3, %v627_v43, %v629_v30  ;;  %683 = vmatpush.bf16.msra.mxu2 %v648_v44 }
  0xb2   : > { %v642_v49 = vsel %vm640_vm0, %v633_v45, 0  ;;  %v645_v50 = vsel %vm640_vm0, %v634_v46, 0 }
  0xb3   : > { %657 = vmatpush.bf16.msra.mxu0 %v642_v49  ;;  %670 = vmatpush.bf16.msra.mxu1 %v645_v50 }
  0xb4   : > { %1080 = vmatmul.msk.bf16.vlgmr.msra.gmra.mxu2 %vm636_vm1, %v1061_v47 }
  0xb5   : > { %786 = vmatpush.bf16.msrb.mxu2 %v771_v42  ;;  %v723_v61 = vpop.f32.mrf.mxu3 }
  0xb6   : > { %1078 = vmatmul.msk.bf16.vlgmr.msra.gmra.mxu0 %vm636_vm1, %v1061_v47  ;;  %1079 = vmatmul.msk.bf16.vlgmr.msra.gmra.mxu1 %vm636_vm1, %v1061_v47  ;;  %v762_v52 = vpop.permute.xlu1 %761 }
  0xb7   : > { %734 = vmatpush.bf16.msrb.mxu0 %v709_v48  ;;  %747 = vmatpush.bf16.msrb.mxu1 %v712_v51 }
  0xb8   : > { %v760_v55 = vpop.permute.xlu0 %759 }
  0xb9   : > { %v766_v56 = vsel %vm763_vm2, %v760_v55, %v762_v52  ;;  %v765_v57 = vsel %vm763_vm2, %v758_v34, %v760_v55 }
  0xba   : > { %v777_v58 = vsel %vm640_vm0, %v766_v56, 0  ;;  %v774_v59 = vsel %vm640_vm0, %v765_v57, 0 }
  0xbb   : > { %799 = vmatpush.bf16.msrb.mxu3 %v774_v59  ;;  %812 = vmatpush.bf16.msra.mxu0 %v777_v58 }
  0xbd   : > { %v725_v62 = vpop.f32.mrf.mxu3 }
  0xbe   : > { %1098 = vmatmul.msk.bf16.vlgmr.msrb.gmra.mxu3 %vm636_vm1, %v1096_v60 }
  0xc4   : > { %1097 = vmatmul.msk.bf16.vlgmr.msrb.gmra.mxu2 %vm636_vm1, %v1096_v60 }
  0xc6   : > { %1094 = vmatmul.msk.bf16.vlgmr.msrb.gmra.mxu0 %vm636_vm1, %v601_v28  ;;  %1095 = vmatmul.msk.bf16.vlgmr.msrb.gmra.mxu1 %vm636_vm1, %v601_v28 }
  0xd6   : > { %1099 = vmatmul.msk.bf16.vlgmr.msra.gmra.mxu0 %vm636_vm1, %v1096_v60 }
 0x133   : > { %v659_v63 = vpop.f32.mrf.mxu0  ;;  %v672_v0 = vpop.f32.mrf.mxu1 }
 0x134   : > { %v724_v10 = vadd.f32 %v723_v61, %v659_v63 }
 0x137   : > { %v685_v1 = vpop.f32.mrf.mxu2 }
 0x13b   : > { %v661_v2 = vpop.f32.mrf.mxu0  ;;  %v674_v3 = vpop.f32.mrf.mxu1 }
 0x13f   : > { %v687_v4 = vpop.f32.mrf.mxu2 }
 0x141   : > { %v801_v5 = vpop.f32.mrf.mxu3 }
 0x143   : > { %v736_v6 = vpop.f32.mrf.mxu0  ;;  %v749_v7 = vpop.f32.mrf.mxu1 }
 0x144   : > { %v737_v8 = vadd.f32 %v736_v6, %v672_v0  ;;  %v750_v23 = vadd.f32 %v749_v7, %v685_v1 }
 0x146   : > { %v819_v11 = vadd.f32 %v801_v5, %v737_v8 }
 0x147   : > { %v788_v12 = vpop.f32.mrf.mxu2 }
 0x148   : > { %v828_v13 = vadd.f32 %v825_v9, %v819_v11  ;;  %v818_v14 = vadd.f32 %v788_v12, %v724_v10 }
 0x149   : > { %v803_v15 = vpop.f32.mrf.mxu3 }
 0x14a   : > { %v827_v16 = vadd.f32 %v825_v9, %v818_v14  ;;  %v831_v19 = vmax.f32 %v828_v13, 0.0 }
 0x14b   : > { %v738_v17 = vpop.f32.mrf.mxu0  ;;  %v751_v18 = vpop.f32.mrf.mxu1 }
 0x14c   : > { %v830_v20 = vmax.f32 %v827_v16, 0.0 }
 0x14e   : > { %v833_v21 = vpack.c.bf16 %v831_v19, %v830_v20 }
 0x14f   : > { %v790_v22 = vpop.f32.mrf.mxu2 }
 0x150   : > { %835 = vst [vmem:[%s586_s12] sm:$0xff] %v833_v21 }
 0x153   : > { %v814_v24 = vpop.f32.mrf.mxu0 }
 0x154   : > { %v820_v25 = vadd.f32 %v814_v24, %v750_v23 }
 0x156   : > { %v829_v26 = vadd.f32 %v825_v9, %v820_v25 }
 0x158   : > { %v832_v27 = vmax.f32 %v829_v26, 0.0 }
 0x15a   : > { %v834_v28 = vpack.c.bf16 %v832_v27, %v832_v27 }
 0x15b   : > { %v816_v29 = vpop.f32.mrf.mxu0 }
 0x15c   : > { %836 = vst [vmem:[%s586_s12 + $0x8] sm:$0xf] %v834_v28 }
 0x15d PF: > { %s14_s19 = sadd.s32 1, %s1245_s19   ;;  %s1409_s15 = smov %s1233_s16 }
 0x15e   : > { %p11_p11 = scmp.ge.s32.totalorder %s14_s19, 4   ;;  %s1410_s16 = smov %s1318_s24 }
 0x15f   : > { %s1411_s17 = smov %s1241_s18  ;;  %s1412_s18 = smov %s1414_s20 }
 0x160   :  { %13 = sbr.rel (!%p11_p11) target bundleno = 3 (0x3), region = 250 }

</bundles_post_ra>
